<compile_context>
chip_gen: v6e
topology: v6e:2x2x1
jax: 0.10.0
libtpu: 0.0.40
codegen_flags: <defaults>
</compile_context>

<pallas_src>
import jax
import jax.numpy as jnp
from jax import lax
from jax.experimental import pallas as pl
from jax.experimental.pallas import tpu as pltpu

# norse LIParameters defaults
DT = 1e-3
TAU_SYN_INV = 1.0 / 5e-3   # 200.0
TAU_MEM_INV = 1.0 / 1e-2   # 100.0
V_LEAK = 0.0

# With zero initial state and v_leak == 0 (LICell defaults), the LI feed-forward
# step collapses to two constant scalings of the conv output (i_jump):
#     v_new = dt*tau_mem_inv * i_jump
#     i_new = (1 - dt*tau_syn_inv) * i_jump
# NOTE: this folded form is only valid for V_LEAK == 0 and zero carried state.
V_GAIN = DT * TAU_MEM_INV        # 0.1
I_GAIN = 1.0 - DT * TAU_SYN_INV  # 0.8

LANE = 128
SMALL_BATCH_MAX = 127  # below this, skip the batch->lane transpose/pad entirely


# ---------------------------------------------------------------------------
# Small-batch path: layout (N, H, W) — H on sublanes, W on lanes.
# ---------------------------------------------------------------------------
def _build_small_batch(Npad, bb, H, W):
    """One grid step processes `bb` images; grid=(Npad//bb,) is 'parallel' so
    v7x's two TensorCores split the batch (2 steps for the N=2 test)."""
    Ho, Wo = H - 2, W - 2

    def kernel(x_ref, w_ref, b_ref, v_ref, i_ref):
        # x_ref: (bb, H, W) VMEM; w_ref: SMEM (9,); b_ref: SMEM (1,)
        w = [w_ref[k] for k in range(9)]   # hoist SMEM scalar reads
        b = b_ref[0]
        # Hoist the three dx (lane-axis) shifts once; the 9 taps below then only
        # need dy (sublane) offsets of the hoisted slices.
        cols = [x_ref[:, :, dx:dx + Wo] for dx in range(3)]    # each (bb, H, Wo)
        acc = w[0] * cols[0][:, 0:Ho, :] + b                   # bias folded in
        for dy in range(3):
            for dx in range(3):
                if dy == 0 and dx == 0:
                    continue
                acc = acc + w[3 * dy + dx] * cols[dx][:, dy:dy + Ho, :]
        # No output transpose exists on this path, so writing both slabs here is
        # the minimum HBM traffic (deriving i in the wrapper would re-read v).
        v_ref[...] = V_GAIN * acc
        i_ref[...] = I_GAIN * acc

    n_blk = Npad // bb
    return pl.pallas_call(
        kernel,
        out_shape=(jax.ShapeDtypeStruct((Npad, Ho, Wo), jnp.float32),   # voltage
                   jax.ShapeDtypeStruct((Npad, Ho, Wo), jnp.float32)),  # syn. current
        grid=(n_blk,),
        in_specs=[
            pl.BlockSpec((bb, H, W), lambda t: (t, 0, 0)),
            pl.BlockSpec(memory_space=pltpu.MemorySpace.SMEM),  # conv weights (9,)
            pl.BlockSpec(memory_space=pltpu.MemorySpace.SMEM),  # conv bias (1,)
        ],
        out_specs=(pl.BlockSpec((bb, Ho, Wo), lambda t: (t, 0, 0)),
                   pl.BlockSpec((bb, Ho, Wo), lambda t: (t, 0, 0))),
        compiler_params=pltpu.CompilerParams(
            dimension_semantics=("parallel",)),
    )


# ---------------------------------------------------------------------------
# Large-batch path: layout (H, W, N) — batch on the 128-lane axis.
# ---------------------------------------------------------------------------
def _pick_lane_tile(Np):
    """Largest lane tile (multiple of 128, <= 512) that divides Np while leaving
    >= 2 grid steps so v7x's second TensorCore has work."""
    for tb in (512, 384, 256, 128):
        if Np % tb == 0 and Np // tb >= 2:
            return tb
    return min(Np, 512)   # Np == 128 case


def _build_lane_batch(H, W, Np, tb):
    """Lane-dense stores (full-width vst), dy shifts are free leading-dim offsets,
    dx shifts hoisted to 3 unaligned sublane slices.  Emits only the conv
    accumulator; v/i come out of the wrapper's output-transpose fusion.
    Per-step VMEM at tb=512 and 16x16 spatial is < 2 MiB double-buffered.
    TODO(synk): if H/W grow large, tile output rows inside the kernel so the
    accumulator does not stream through VMEM."""
    Ho, Wo = H - 2, W - 2
    n_tiles = Np // tb

    def kernel(x_ref, w_ref, b_ref, o_ref):
        # x_ref: (H, W, tb) — H leading, W sublane, batch lane.
        w = [w_ref[k] for k in range(9)]
        b = b_ref[0]
        # Hoist the 3 unaligned sublane (dx) slices once.
        cols = [x_ref[:, dx:dx + Wo, :] for dx in range(3)]    # each (H, Wo, tb)
        acc = w[0] * cols[0][0:Ho] + b
        for dy in range(3):
            for dx in range(3):
                if dy == 0 and dx == 0:
                    continue
                acc = acc + w[3 * dy + dx] * cols[dx][dy:dy + Ho]
        o_ref[...] = acc    # conv + bias (= i_jump); single output slab

    return pl.pallas_call(
        kernel,
        out_shape=jax.ShapeDtypeStruct((Ho, Wo, Np), jnp.float32),
        grid=(n_tiles,),
        in_specs=[
            pl.BlockSpec((H, W, tb), lambda t: (0, 0, t)),
            pl.BlockSpec(memory_space=pltpu.MemorySpace.SMEM),
            pl.BlockSpec(memory_space=pltpu.MemorySpace.SMEM),
        ],
        out_specs=pl.BlockSpec((Ho, Wo, tb), lambda t: (0, 0, t)),
        compiler_params=pltpu.CompilerParams(
            dimension_semantics=("parallel",)),   # batch tiles split across v7x's 2 TCs
    )


# ---------------------------------------------------------------------------
# Wrapper
# ---------------------------------------------------------------------------
def model_forward(x_nchw, w_oihw, b):
    """x_nchw: (N, 1, H, W) f32; w_oihw: (1, 1, 3, 3); b: (1,).
    Returns (v, (v, i)) mirroring norse LICell's (output, state)."""
    N, C, H, W = x_nchw.shape
    assert C == 1  # TODO(synk): multi-channel Conv2d not implemented (module fixes C_in=C_out=1)
    Ho, Wo = H - 2, W - 2

    w9 = w_oihw.reshape(9).astype(jnp.float32)
    b1 = b.reshape(1).astype(jnp.float32)
    x3 = x_nchw.reshape(N, H, W).astype(jnp.float32)   # drop C=1: pure reshape, no data movement

    if N <= SMALL_BATCH_MAX:
        # Natural layout: no transpose, no 128-lane padding.
        bb = max(1, -(-N // 2))       # ceil(N/2): >= 2 grid steps when N >= 2 (v7x)
        nb = -(-N // bb)
        Npad = nb * bb
        if Npad != N:
            # Padded images see conv(0)+bias = bias -> garbage rows; sliced off below.
            x3 = jnp.pad(x3, ((0, Npad - N), (0, 0), (0, 0)))
        v, i = _build_small_batch(Npad, bb, H, W)(x3, w9, b1)
        v = v[:N, None]               # (N, 1, Ho, Wo); pure reshape when Npad == N
        i = i[:N, None]
        return v, (v, i)

    # Large batch: batch on the lane axis (lane-dense stores).
    Np = -(-N // LANE) * LANE
    x_hwn = jnp.transpose(x3, (1, 2, 0))                  # (H, W, N)
    if Np != N:
        # Padded lanes see conv(0)+bias = bias -> garbage; sliced off below.
        x_hwn = jnp.pad(x_hwn, ((0, 0), (0, 0), (0, Np - N)))
    tb = _pick_lane_tile(Np)
    acc = _build_lane_batch(H, W, Np, tb)(x_hwn, w9, b1)  # (Ho, Wo, Np) = conv + bias
    # One fusion reads the accumulator once and emits both v and i in NCHW.
    acc = jnp.transpose(acc[:, :, :N], (2, 0, 1))[:, None]  # (N, 1, Ho, Wo)
    v = V_GAIN * acc
    i = I_GAIN * acc
    return v, (v, i)


def reference_forward(x_nchw, w_oihw, b):
    conv = lax.conv_general_dilated(
        x_nchw, w_oihw, window_strides=(1, 1), padding="VALID",
        dimension_numbers=("NCHW", "OIHW", "NCHW")) + b.reshape(1, 1, 1, 1)
    i_jump = conv
    v_new = DT * TAU_MEM_INV * ((V_LEAK - 0.0) + i_jump)
    i_new = i_jump - DT * TAU_SYN_INV * i_jump
    return v_new, i_new


if __name__ == "__main__":
    key = jax.random.PRNGKey(0)
    kx, kw, kb, kx2 = jax.random.split(key, 4)

    H, W = 16, 16
    # deterministic "Conv2d(1,1,3)" parameters (uniform in +/- 1/sqrt(fan_in), fan_in = 9)
    bound = 1.0 / jnp.sqrt(9.0)
    w = jax.random.uniform(kw, (1, 1, 3, 3), minval=-bound, maxval=bound, dtype=jnp.float32)
    b = jax.random.uniform(kb, (1,), minval=-bound, maxval=bound, dtype=jnp.float32)

    # Module-shaped test (small-batch path): batch=2, channels=1, 16x16.
    x = jax.random.normal(kx, (2, 1, H, W), dtype=jnp.float32)
    v, (v_state, i_state) = model_forward(x, w, b)
    jax.block_until_ready((v, i_state))
    v_ref, i_ref = reference_forward(x, w, b)
    assert jnp.allclose(v, v_ref, atol=1e-5, rtol=1e-5)
    assert jnp.allclose(i_state, i_ref, atol=1e-5, rtol=1e-5)

    # Also exercise the lane-dense large-batch path (batch >= 128).
    x_big = jax.random.normal(kx2, (256, 1, H, W), dtype=jnp.float32)
    v2, (v2_state, i2_state) = model_forward(x_big, w, b)
    jax.block_until_ready((v2, i2_state))
    v2_ref, i2_ref = reference_forward(x_big, w, b)
    assert jnp.allclose(v2, v2_ref, atol=1e-5, rtol=1e-5)
    assert jnp.allclose(i2_state, i2_ref, atol=1e-5, rtol=1e-5)

    print("KERNEL_OK")
</pallas_src>

<mosaic_0001>
module attributes {stable_mosaic.version = 11 : i64} {
  func.func @kernel(%arg0: i32, %arg1: memref<1x16x16xf32, #tpu.memory_space<vmem>>, %arg2: memref<9xf32, #tpu.memory_space<smem>>, %arg3: memref<1xf32, #tpu.memory_space<smem>>, %arg4: memref<1x14x14xf32, #tpu.memory_space<vmem>>, %arg5: memref<1x14x14xf32, #tpu.memory_space<vmem>>) attributes {dimension_semantics = [#tpu.dimension_semantics<parallel>], iteration_bounds = array<i64: 2>, scalar_prefetch = 0 : i64, scratch_operands = 0 : i64, tpu.core_type = #tpu.core_type<tc>, window_params = [{transform_indices = @transform_0, window_bounds = array<i64: 1, 16, 16>}, {transform_indices = @transform_1, window_bounds = array<i64: 9>}, {transform_indices = @transform_2, window_bounds = array<i64: 1>}, {transform_indices = @transform_3, window_bounds = array<i64: 1, 14, 14>}, {transform_indices = @transform_4, window_bounds = array<i64: 1, 14, 14>}]} {
    %c0 = arith.constant 0 : index
    %0 = memref.load %arg2[%c0] : memref<9xf32, #tpu.memory_space<smem>>
    %c1 = arith.constant 1 : index
    %1 = memref.load %arg2[%c1] : memref<9xf32, #tpu.memory_space<smem>>
    %c2 = arith.constant 2 : index
    %2 = memref.load %arg2[%c2] : memref<9xf32, #tpu.memory_space<smem>>
    %c3 = arith.constant 3 : index
    %3 = memref.load %arg2[%c3] : memref<9xf32, #tpu.memory_space<smem>>
    %c4 = arith.constant 4 : index
    %4 = memref.load %arg2[%c4] : memref<9xf32, #tpu.memory_space<smem>>
    %c5 = arith.constant 5 : index
    %5 = memref.load %arg2[%c5] : memref<9xf32, #tpu.memory_space<smem>>
    %c6 = arith.constant 6 : index
    %6 = memref.load %arg2[%c6] : memref<9xf32, #tpu.memory_space<smem>>
    %c7 = arith.constant 7 : index
    %7 = memref.load %arg2[%c7] : memref<9xf32, #tpu.memory_space<smem>>
    %c8 = arith.constant 8 : index
    %8 = memref.load %arg2[%c8] : memref<9xf32, #tpu.memory_space<smem>>
    %c0_0 = arith.constant 0 : index
    %9 = memref.load %arg3[%c0_0] : memref<1xf32, #tpu.memory_space<smem>>
    %c0_1 = arith.constant 0 : index
    %c0_2 = arith.constant 0 : index
    %c0_3 = arith.constant 0 : index
    %10 = vector.load %arg1[%c0_1, %c0_2, %c0_3] : memref<1x16x16xf32, #tpu.memory_space<vmem>>, vector<1x16x14xf32>
    %c0_4 = arith.constant 0 : index
    %c0_5 = arith.constant 0 : index
    %c1_6 = arith.constant 1 : index
    %11 = vector.load %arg1[%c0_4, %c0_5, %c1_6] : memref<1x16x16xf32, #tpu.memory_space<vmem>>, vector<1x16x14xf32>
    %c0_7 = arith.constant 0 : index
    %c0_8 = arith.constant 0 : index
    %c2_9 = arith.constant 2 : index
    %12 = vector.load %arg1[%c0_7, %c0_8, %c2_9] : memref<1x16x16xf32, #tpu.memory_space<vmem>>, vector<1x16x14xf32>
    %13 = vector.extract_strided_slice %10 {offsets = [0, 0, 0], sizes = [1, 14, 14], strides = [1, 1, 1]} : vector<1x16x14xf32> to vector<1x14x14xf32>
    %14 = vector.broadcast %0 : f32 to vector<1x14x14xf32>
    %15 = arith.mulf %14, %13 : vector<1x14x14xf32>
    %16 = vector.broadcast %9 : f32 to vector<1x14x14xf32>
    %17 = arith.addf %15, %16 : vector<1x14x14xf32>
    %18 = vector.extract_strided_slice %11 {offsets = [0, 0, 0], sizes = [1, 14, 14], strides = [1, 1, 1]} : vector<1x16x14xf32> to vector<1x14x14xf32>
    %19 = vector.broadcast %1 : f32 to vector<1x14x14xf32>
    %20 = arith.mulf %19, %18 : vector<1x14x14xf32>
    %21 = arith.addf %17, %20 : vector<1x14x14xf32>
    %22 = vector.extract_strided_slice %12 {offsets = [0, 0, 0], sizes = [1, 14, 14], strides = [1, 1, 1]} : vector<1x16x14xf32> to vector<1x14x14xf32>
    %23 = vector.broadcast %2 : f32 to vector<1x14x14xf32>
    %24 = arith.mulf %23, %22 : vector<1x14x14xf32>
    %25 = arith.addf %21, %24 : vector<1x14x14xf32>
    %26 = vector.extract_strided_slice %10 {offsets = [0, 1, 0], sizes = [1, 14, 14], strides = [1, 1, 1]} : vector<1x16x14xf32> to vector<1x14x14xf32>
    %27 = vector.broadcast %3 : f32 to vector<1x14x14xf32>
    %28 = arith.mulf %27, %26 : vector<1x14x14xf32>
    %29 = arith.addf %25, %28 : vector<1x14x14xf32>
    %30 = vector.extract_strided_slice %11 {offsets = [0, 1, 0], sizes = [1, 14, 14], strides = [1, 1, 1]} : vector<1x16x14xf32> to vector<1x14x14xf32>
    %31 = vector.broadcast %4 : f32 to vector<1x14x14xf32>
    %32 = arith.mulf %31, %30 : vector<1x14x14xf32>
    %33 = arith.addf %29, %32 : vector<1x14x14xf32>
    %34 = vector.extract_strided_slice %12 {offsets = [0, 1, 0], sizes = [1, 14, 14], strides = [1, 1, 1]} : vector<1x16x14xf32> to vector<1x14x14xf32>
    %35 = vector.broadcast %5 : f32 to vector<1x14x14xf32>
    %36 = arith.mulf %35, %34 : vector<1x14x14xf32>
    %37 = arith.addf %33, %36 : vector<1x14x14xf32>
    %38 = vector.extract_strided_slice %10 {offsets = [0, 2, 0], sizes = [1, 14, 14], strides = [1, 1, 1]} : vector<1x16x14xf32> to vector<1x14x14xf32>
    %39 = vector.broadcast %6 : f32 to vector<1x14x14xf32>
    %40 = arith.mulf %39, %38 : vector<1x14x14xf32>
    %41 = arith.addf %37, %40 : vector<1x14x14xf32>
    %42 = vector.extract_strided_slice %11 {offsets = [0, 2, 0], sizes = [1, 14, 14], strides = [1, 1, 1]} : vector<1x16x14xf32> to vector<1x14x14xf32>
    %43 = vector.broadcast %7 : f32 to vector<1x14x14xf32>
    %44 = arith.mulf %43, %42 : vector<1x14x14xf32>
    %45 = arith.addf %41, %44 : vector<1x14x14xf32>
    %46 = vector.extract_strided_slice %12 {offsets = [0, 2, 0], sizes = [1, 14, 14], strides = [1, 1, 1]} : vector<1x16x14xf32> to vector<1x14x14xf32>
    %47 = vector.broadcast %8 : f32 to vector<1x14x14xf32>
    %48 = arith.mulf %47, %46 : vector<1x14x14xf32>
    %49 = arith.addf %45, %48 : vector<1x14x14xf32>
    %cst = arith.constant 1.000000e-01 : f32
    %50 = vector.broadcast %cst : f32 to vector<1x14x14xf32>
    %51 = arith.mulf %50, %49 : vector<1x14x14xf32>
    %c0_10 = arith.constant 0 : index
    %c0_11 = arith.constant 0 : index
    %c0_12 = arith.constant 0 : index
    %52 = vector.load %arg4[%c0_10, %c0_11, %c0_12] : memref<1x14x14xf32, #tpu.memory_space<vmem>>, vector<1x14x14xf32>
    tpu.vector_store %arg4[%c0_10, %c0_11, %c0_12], %51 {strides = array<i32>} : memref<1x14x14xf32, #tpu.memory_space<vmem>>, vector<1x14x14xf32>,
    %cst_13 = arith.constant 8.000000e-01 : f32
    %53 = vector.broadcast %cst_13 : f32 to vector<1x14x14xf32>
    %54 = arith.mulf %53, %49 : vector<1x14x14xf32>
    %c0_14 = arith.constant 0 : index
    %c0_15 = arith.constant 0 : index
    %c0_16 = arith.constant 0 : index
    %55 = vector.load %arg5[%c0_14, %c0_15, %c0_16] : memref<1x14x14xf32, #tpu.memory_space<vmem>>, vector<1x14x14xf32>
    tpu.vector_store %arg5[%c0_14, %c0_15, %c0_16], %54 {strides = array<i32>} : memref<1x14x14xf32, #tpu.memory_space<vmem>>, vector<1x14x14xf32>,
    return
  }
  func.func @transform_0(%arg0: i32) -> (i32, i32, i32) {
    %c0_i32 = arith.constant 0 : i32
    %c0_i32_0 = arith.constant 0 : i32
    %c0_i32_1 = arith.constant 0 : i32
    return %arg0, %c0_i32, %c0_i32_0 : i32, i32, i32
  }
  func.func @transform_1(%arg0: i32) -> i32 {
    %c0_i32 = arith.constant 0 : i32
    %c0_i32_0 = arith.constant 0 : i32
    return %c0_i32 : i32
  }
  func.func @transform_2(%arg0: i32) -> i32 {
    %c0_i32 = arith.constant 0 : i32
    %c0_i32_0 = arith.constant 0 : i32
    return %c0_i32 : i32
  }
  func.func @transform_3(%arg0: i32) -> (i32, i32, i32) {
    %c0_i32 = arith.constant 0 : i32
    %c0_i32_0 = arith.constant 0 : i32
    %c0_i32_1 = arith.constant 0 : i32
    return %arg0, %c0_i32, %c0_i32_0 : i32, i32, i32
  }
  func.func @transform_4(%arg0: i32) -> (i32, i32, i32) {
    %c0_i32 = arith.constant 0 : i32
    %c0_i32_0 = arith.constant 0 : i32
    %c0_i32_1 = arith.constant 0 : i32
    return %arg0, %c0_i32, %c0_i32_0 : i32, i32, i32
  }
}

</mosaic_0001>

<bundles_post_ra>
// kernel: tpu_custom_call.1
= control target key start
LH: loop header
LB: loop body
LE: loop exit
PB: predicated region body
PF: predicated region fallthrough
CT: control target
= control target key end

     0   :  { %s869_s0 = inlined_call_operand.hbm [shape: f32[2,16,16], index: 0, kind: input, shape index: {}]   ;;  %s870_s1 = inlined_call_operand.vmem [shape: f32[9], index: 1, kind: input, shape index: {}]   ;;  %s871_s2 = inlined_call_operand.<no memory space> [shape: f32[1], index: 2, kind: input, shape index: {}]   ;;  %s872_s3 = inlined_call_operand.vmem [shape: f32[2,14,14], index: 3, kind: output, shape index: {0}]   ;;  %s873_s4 = inlined_call_operand.vmem [shape: f32[2,14,14], index: 4, kind: output, shape index: {1}]  }
   0x1   :  { %10 = sst [smem:[#allocation2]] %s871_s2 }
   0x2   :  { %11 = vsyncpa [#allocation4], 0 }
   0x3   :  { %13 = vsyncpa [#allocation4 + $0x1], 0 }
   0x4   :  { %14 = vsyncpa [#allocation5], 0  ;;  %s700_s17 = smov 0   ;;  %s702_s18 = smov 0  }
   0x5   :  { %s704_s19 = smov 0   ;;  %s706_s20 = smov 0  }
   0x6 LB: > { %s719_s2 = sadd.s32 4294967295, %s664_s20   ;;  %s722_s21 = sadd.s32 1, %s664_s20   ;;  %s664_s20 = sphi %s706_s20, %s888_s20   ;;  %s660_s19 = sphi %s704_s19, %s887_s19   ;;  %s656_s18 = sphi %s702_s18, %s886_s18   ;;  %s652_s17 = sphi %s700_s17, %s885_s17  }
   0x7   : > { %s24_s22 = ssub.s32 %s664_s20, %s722_s21  ;;  %s27_s23 = sadd.s32 1, %s660_s19 }
   0x8   : > { %p25_p0 = scmp.eq.s32.totalorder %s24_s22, 0  ;;  %p34_p1 = scmp.ne.s32.totalorder %s660_s19, %s656_s18 }
   0x9   : > { %p35_p2 = scmp.eq.s32.totalorder %s664_s20, 0  ;;  %p40_p3 = scmp.ne.s32.totalorder %s656_s18, %s652_s17 }
   0xa   : > { %s732_s24 = scalar_select %p25_p0, %s660_s19, %s27_s23  }
   0xb   : > { %p36_p4 = por %p35_p2, %p34_p1  ;;  %p876_p5 = scmp.eq.s32.totalorder %s719_s2, 0 }
   0xc   : > { %p503_p6 = scmp.ge.s32.totalorder %s664_s20, 1  ;;  %p145_p7 = scmp.lt.s32.totalorder %s664_s20, 3 }
   0xd   : > { %p739_p8 = por %p876_p5, %p40_p3  ;;  %s158_s29 = sshll.u32 %s870_s1, 4  ;;  %s159_s29 = int_to_ptr.vmem [resolvable:$true] %s158_s29 }
   0xe   : > { %p743_p9 = pnand %p503_p6, %p145_p7  ;;  %p544_p11 = scmp.lt.s32.totalorder %s664_s20, 2 }
   0xf   : > { %s877_s25 = scalar_select %p739_p8, 1, 0 }
  0x10   : > { %s878_s26 = scalar_select %p743_p9, 1, 0 }
  0x11   : > { %p535_p10 = pneg %p743_p9  ;;  %s172_s30 = sand.u32 1, %s660_s19  }
  0x12   : > { %p760_p13 = pnand %p544_p11, %p36_p4  ;;  %s506_s7 = sshll.u32 %s172_s30, 4 }
  0x13   : > { %p756_p12 = pnand %p535_p10, %p876_p5  ;;  %s583_s8 = scalar_lea.vmem %s159_s29, 16 }
  0x14   : > { %p584_p0 = scmp.ne.s32.totalorder %s159_s29, %s583_s8  ;;  %p591_p6 = scmp.lt.s32.totalorder %s159_s29, %s159_s29 }
  0x15   : > { %p585_p1 = pneg %p756_p12  ;;  %p592_p7 = scmp.lt.s32.totalorder %s583_s8, %s583_s8 }
  0x17   : > { %p586_p2 = pnand %p585_p1, %p584_p0  ;;  %p593_p8 = por %p592_p7, %p591_p6 }
  0x19   : > { %p587_p3 = pneg %p586_p2 }
  0x1b   : > { %p594_p9 = pnand %p593_p8, %p587_p3 }
  0x1d   : > { %597 = shalt.err (!%p594_p9)
}
  0x1e   : > { %s666_s9 = smov [#allocation6]   ;;  %s526_s10 = sshll.u32 %s664_s20, 8 }
  0x1f   : > { %538 = dma.vmem_to_smem (!%p756_p12), %s159_s29, 16, %s666_s9, [#allocation5]  }
  0x20   : > { %s772_s13 = scalar_lea.hbm %s869_s0, %s526_s10  ;;  %s176_s14 = scalar_lea.vmem [#allocation3], %s506_s7 }
  0x21   : > { %s183_s15 = sshll.u32 %s176_s14, 4  ;;  %s776_s16 = scalar_lea.sflag [#allocation4], %s172_s30  ;;  %s774_s15 = int_to_ptr.vmem [resolvable:$true] %s183_s15 }
  0x22   : > { %s598_s17 = scalar_lea.hbm %s772_s13, 256  ;;  %p600_p8 = pneg %p760_p13 }
  0x23   : > { %p599_p4 = scmp.ne.s32.totalorder %s772_s13, %s598_s17  ;;  %s603_s23 = scalar_lea.hbm %s869_s0, 512 }
  0x24   : > { %p604_p11 = scmp.lt.s32.totalorder %s772_s13, %s869_s0  ;;  %p605_p12 = scmp.lt.s32.totalorder %s603_s23, %s598_s17 }
  0x25   : > { %p601_p9 = pnand %p600_p8, %p599_p4 }
  0x26   : > { %p606_p0 = por %p605_p12, %p604_p11 }
  0x27   : > { %p602_p10 = pneg %p601_p9 }
  0x29   : > { %p607_p1 = pnand %p606_p0, %p602_p10 }
  0x2b   : > { %610 = shalt.err (!%p607_p1)
}
  0x2c   : > { %s611_s29 = scalar_lea.vmem %s774_s15, 256  ;;  %s667_s30 = smov [#allocation3]  }
  0x2d   : > { %p612_p2 = scmp.ne.s32.totalorder %s774_s15, %s611_s29  ;;  %s616_s5 = sshll.u32 %s667_s30, 4  ;;  %s617_s5 = int_to_ptr.vmem [resolvable:$false] %s616_s5 }
  0x2e   : > { %s618_s7 = scalar_lea.vmem %s617_s5, 512  ;;  %p619_p7 = scmp.lt.s32.totalorder %s774_s15, %s617_s5 }
  0x2f   : > { %p614_p3 = pnand %p612_p2, %p600_p8  ;;  %p620_p4 = scmp.lt.s32.totalorder %s618_s7, %s611_s29 }
  0x31   : > { %p615_p6 = pneg %p614_p3  ;;  %p621_p9 = por %p620_p4, %p619_p7 }
  0x33   : > { %p622_p5 = pnand %p621_p9, %p615_p6 }
  0x35   : > { %625 = shalt.err (!%p622_p5)
}
  0x36   : > { %s668_s8 = smov 128   ;;  %s669_s9 = smov 8  }
  0x37   : > { %542 = dma.hbm_to_vmem [thread:$0]  (!%p760_p13), %s772_s13, 256, %s774_s15, %s776_s16, %s668_s8, %s668_s8, %s669_s9  }
  0x38   : > { %p881_p8 = scmp.ne.s32.totalorder %s878_s26, 0 }
  0x39   : > { %s197_s10 = sand.u32 (!%p881_p8), 1, %s656_s18   ;;  %p882_p10 = scmp.ne.s32.totalorder (!%p881_p8), %s877_s25, 0 }
  0x3a   : > { %195 = sbr.rel (%p881_p8) target bundleno = 220 (0xdc), region = 32  ;;  %s510_s11 = sshll.u32 (!%p881_p8), %s197_s10, 4 }
  0x3b   : > { %s198_s12 = scalar_lea.sflag (!%p881_p8), [#allocation4], %s197_s10  ;;  %s201_s14 = scalar_lea.vmem (!%p881_p8), [#allocation3], %s510_s11 }
  0x3f   : > { %643 = dma.done.wait (%p882_p10), %s198_s12, 256  }
  0x40   : > { %645 = vsyncadd (%p882_p10), %s198_s12, 4294967040  ;;  %p883_p5 = scmp.eq.s32.totalorder %s719_s2, 0 }
  0x42   : > { %647 = dma.done.wait (%p883_p5), [#allocation5], 16   ;;  %p884_p11 = pmov %p883_p5 }
  0x44   : > { %649 = vsyncadd (%p884_p11), [#allocation5], 4294967280 }
  0x45   : > { %210 = sfence }
  0x46   : > { %s517_s26 = sld [smem:[#allocation6 + $0x2]]  ;;  %v808_v0 = vld [vmem:[%s201_s14] sm:$0xff]  ;;  %v810_v1 = vld [vmem:[%s201_s14 + $0x8] sm:$0xff]  ;;  %s670_s20 = smov 126   ;;  %vm295_vm0 = vcmask 1046528   ;;  %vm340_vm1 = vcmask 1045504  }
  0x47   : > { %s516_s6 = sld [smem:[#allocation6 + $0x1]]  ;;  %s671_s23 = smov 127   ;;  %vm384_vm2 = vcmask 111616   ;;  %vm382_vm3 = vcmask 113664  }
  0x48   : > { %s519_s13 = sld [smem:[#allocation6 + $0x4]]  ;;  %p236_p13 = scmp.lt.s32.totalorder %s719_s2, 1 }
  0x49   : > { %s520_s15 = sld [smem:[#allocation6 + $0x5]] }
  0x4a   : > { %s522_s16 = sld [smem:[#allocation6 + $0x7]]  ;;  %s890_s2 = smov (!%p236_p13, %s719_s2), 1 }
  0x4b   : > { %s813_s25 = sld [smem:[#allocation6 + $0x8]]  ;;  %s527_s29 = sshll.u32 %s890_s2, 4 }
  0x4c   : > { %v277_v2 = vstv %s517_s26  ;;  %s518_s17 = sld [smem:[#allocation6 + $0x3]]  ;;  %s240_s7 = scalar_lea.vmem %s872_s3, %s527_s29 }
  0x4d   : > { %v278_v3 = vmul.f32 %v277_v2, %v808_v0  ;;  %v264_v4 = vstv %s516_s6  ;;  %v279_v7 = vmul.f32 %v277_v2, %v810_v1  ;;  %s521_s22 = sld [smem:[#allocation6 + $0x6]]  ;;  %s245_s10 = scalar_lea.vmem %s873_s4, %s527_s29 }
  0x4e   : > { %v265_v5 = vmul.f32 %v264_v4, %v808_v0  ;;  %v303_v6 = vstv %s519_s13  ;;  %v266_v11 = vmul.f32 %v264_v4, %v810_v1  ;;  %s246_s27 = sld [smem:[#allocation6]] }
  0x4f   : > { %282 = vrot.lane.b32.xlu1 %v278_v3, %s670_s20  ;;  %v304_v8 = vmul.f32 %v303_v6, %v808_v0  ;;  %v305_v9 = vmul.f32 %v303_v6, %v810_v1  ;;  %v319_v10 = vstv %s520_s15  ;;  %s255_s28 = sld [smem:[#allocation2]] }
  0x50   : > { %269 = vrot.lane.b32.xlu0 %v265_v5, %s671_s23  ;;  %v348_v12 = vstv %s522_s16  ;;  %v320_v15 = vmul.f32 %v319_v10, %v808_v0  ;;  %v321_v16 = vmul.f32 %v319_v10, %v810_v1 }
  0x51   : > { %v309_v13 = vrot.slane %v305_v9, 1  ;;  %v308_v14 = vrot.slane %v304_v8, 1  ;;  %v350_v17 = vmul.f32 %v348_v12, %v810_v1  ;;  %v349_v18 = vmul.f32 %v348_v12, %v808_v0 }
  0x52   : > { %v290_v19 = vstv %s518_s17  ;;  %v325_v21 = vrot.slane %v321_v16, 1  ;;  %v324_v22 = vrot.slane %v320_v15, 1  ;;  %v364_v23 = vstv %s813_s25 }
  0x53   : > { %284 = vrot.lane.b32.xlu1 %v279_v7, %s670_s20  ;;  %v310_v20 = vsel %vm295_vm0, %v308_v14, %v309_v13  ;;  %v291_v24 = vmul.f32 %v290_v19, %v808_v0  ;;  %v292_v25 = vmul.f32 %v290_v19, %v810_v1  ;;  %v335_v26 = vstv %s521_s22 }
  0x54   : > { %271 = vrot.lane.b32.xlu0 %v266_v11, %s671_s23  ;;  %v354_v27 = vrot.slane %v350_v17, 2  ;;  %v336_v28 = vmul.f32 %v335_v26, %v808_v0  ;;  %v337_v29 = vmul.f32 %v335_v26, %v810_v1  ;;  %v353_v30 = vrot.slane %v349_v18, 2 }
  0x55   : > { %v365_v31 = vmul.f32 %v364_v23, %v808_v0  ;;  %v296_v32 = vrot.slane %v291_v24, 1  ;;  %v297_v33 = vrot.slane %v292_v25, 1  ;;  %v326_v34 = vsel %vm295_vm0, %v324_v22, %v325_v21 }
  0x56   : > { %v366_v35 = vmul.f32 %v364_v23, %v810_v1  ;;  %v341_v36 = vrot.slane %v336_v28, 2  ;;  %v342_v37 = vrot.slane %v337_v29, 2  ;;  %v355_v40 = vsel %vm340_vm1, %v353_v30, %v354_v27 }
  0x57   : > { %313 = vrot.lane.b32.xlu1 %v309_v13, %s671_s23  ;;  %v298_v38 = vsel %vm295_vm0, %v296_v32, %v297_v33  ;;  %v369_v42 = vrot.slane %v365_v31, 2  ;;  %v258_v44 = vstv %s246_s27  ;;  %v261_v46 = vstv %s255_s28 }
  0x58   : > { %311 = vrot.lane.b32.xlu0 %v310_v20, %s671_s23  ;;  %v343_v39 = vsel %vm340_vm1, %v341_v36, %v342_v37  ;;  %v370_v41 = vrot.slane %v366_v35, 2  ;;  %v259_v45 = vmul.f32 %v258_v44, %v808_v0  ;;  %v260_v48 = vmul.f32 %v258_v44, %v810_v1 }
  0x5a   : > { %v371_v43 = vsel %vm340_vm1, %v369_v42, %v370_v41  ;;  %v262_v47 = vadd.f32 %v261_v46, %v259_v45  ;;  %v263_v52 = vadd.f32 %v261_v46, %v260_v48 }
  0x5b   : > { %329 = vrot.lane.b32.xlu1 %v325_v21, %s670_s20 }
  0x5c   : > { %327 = vrot.lane.b32.xlu0 %v326_v34, %s670_s20 }
  0x5f   : > { %358 = vrot.lane.b32.xlu1 %v354_v27, %s671_s23 }
  0x60   : > { %356 = vrot.lane.b32.xlu0 %v355_v40, %s671_s23 }
  0x63   : > { %374 = vrot.lane.b32.xlu1 %v370_v41, %s670_s20 }
  0x64   : > { %372 = vrot.lane.b32.xlu0 %v371_v43, %s670_s20 }
  0xc1   : > { %v283_v49 = vpop.permute.xlu1 %282 }
  0xc2   : > { %v270_v50 = vpop.permute.xlu0 %269 }
  0xc3   : > { %v275_v51 = vadd.f32 %v270_v50, %v262_v47 }
  0xc5   : > { %v288_v53 = vadd.f32 %v283_v49, %v275_v51  ;;  %v285_v54 = vpop.permute.xlu1 %284 }
  0xc6   : > { %v272_v55 = vpop.permute.xlu0 %271 }
  0xc7   : > { %v276_v56 = vadd.f32 %v272_v55, %v263_v52  ;;  %v301_v57 = vadd.f32 %v298_v38, %v288_v53 }
  0xc9   : > { %v289_v58 = vadd.f32 %v285_v54, %v276_v56  ;;  %v314_v59 = vpop.permute.xlu1 %313 }
  0xca   : > { %v312_v60 = vpop.permute.xlu0 %311 }
  0xcb   : > { %v302_v61 = vadd.f32 %v297_v33, %v289_v58  ;;  %v317_v63 = vadd.f32 %v312_v60, %v301_v57 }
  0xcd   : > { %v318_v62 = vadd.f32 %v314_v59, %v302_v61  ;;  %v330_v0 = vpop.permute.xlu1 %329 }
  0xce   : > { %v328_v2 = vpop.permute.xlu0 %327 }
  0xcf   : > { %v334_v1 = vadd.f32 %v330_v0, %v318_v62  ;;  %v333_v3 = vadd.f32 %v328_v2, %v317_v63 }
  0xd1   : > { %v359_v4 = vpop.permute.xlu1 %358  ;;  %v347_v5 = vadd.f32 %v342_v37, %v334_v1  ;;  %v346_v6 = vadd.f32 %v343_v39, %v333_v3 }
  0xd2   : > { %v357_v7 = vpop.permute.xlu0 %356 }
  0xd3   : > { %v363_v8 = vadd.f32 %v359_v4, %v347_v5  ;;  %v362_v9 = vadd.f32 %v357_v7, %v346_v6 }
  0xd5   : > { %v375_v10 = vpop.permute.xlu1 %374 }
  0xd6   : > { %v379_v11 = vadd.f32 %v375_v10, %v363_v8  ;;  %v373_v12 = vpop.permute.xlu0 %372 }
  0xd7   : > { %v378_v13 = vadd.f32 %v373_v12, %v362_v9 }
  0xd8   : > { %v381_v14 = vmul.f32 0.1, %v379_v11  ;;  %v387_v15 = vmul.f32 0.8, %v379_v11 }
  0xd9   : > { %v380_v16 = vmul.f32 0.1, %v378_v13  ;;  %v386_v17 = vmul.f32 0.8, %v378_v13 }
  0xda   : > { %385 = vst.msk [vmem:[%s240_s7 + $0x8] sm:$0x3f] %vm384_vm2, %v381_v14  ;;  %389 = vst.msk [vmem:[%s245_s10 + $0x8] sm:$0x3f] %vm384_vm2, %v387_v15 }
  0xdb   : > { %383 = vst.msk [vmem:[%s240_s7] sm:$0xff] %vm382_vm3, %v380_v16  ;;  %388 = vst.msk [vmem:[%s245_s10] sm:$0xff] %vm382_vm3, %v386_v17 }
  0xdc PF: > { %p17_p12 = scmp.ge.s32.totalorder %s722_s21, 4   ;;  %s885_s17 = smov %s656_s18 }
  0xdd   : > { %s886_s18 = smov %s660_s19  ;;  %s887_s19 = smov %s732_s24 }
  0xde   : > { %s888_s20 = smov %s722_s21  ;;  %19 = sbr.rel (!%p17_p12) target bundleno = 6 (0x6), region = 89 }
  0xe3   :  { %427 = vsyncpa [#allocation4], 1 }
  0xe4   :  { %429 = vsyncpa [#allocation4 + $0x1], 1 }
  0xe5   :  { %430 = vsyncpa [#allocation5], 1 }
  0xe6   :  { %432 = vsyncpa [#allocation5 + $0x1], 1 }

</bundles_post_ra>
